<compile_context>
chip_gen: v5e
topology: v5e:2x2
jax: 0.10.0
libtpu: 0.0.40
codegen_flags: <defaults>
</compile_context>

<pallas_src>
import functools

import jax
import jax.numpy as jnp
from jax import lax
from jax.experimental import pallas as pl
from jax.experimental.pallas import tpu as pltpu


def _round_up(x, mult):
    return (x + mult - 1) // mult * mult


def _log_sigmoid(x):
    # numerically-stable log(sigmoid(x)) = min(x, 0) - log1p(exp(-|x|))
    return jnp.minimum(x, 0.0) - jnp.log1p(jnp.exp(-jnp.abs(x)))


def _recip(x):
    # EUP approximate reciprocal + one Newton step (keeps the divide off the
    # VPU while recovering ~f32 accuracy).
    r = pl.reciprocal(x, approx=True)
    return r * (2.0 - x * r)


def _match_kernel(desc0_ref, desc1_ref, wf_ref, bfuse_ref, wm_ref, bm_ref,
                  kn_ref, logscores_ref, kassign_ref,
                  *, dim, m, n, topk, threshold, multiply_matchability):
    # Per grid step (one batch element):
    #   desc0_ref : (1, MP, d) f32   rows >= m are zero padding
    #   desc1_ref : (1, NP, d) f32   rows >= n are zero padding
    #   wf_ref    : (d, DP) bf16     [ final_proj.W^T | matchability.W^T | 0 ]
    #   bfuse_ref : (1, DP) f32      [ final_proj.b   | matchability.b   | 0 ]
    #   wm_ref    : (1, d) bf16      matchability weight row
    #   bm_ref    : (1, 1) f32       matchability bias
    # Outputs are full lane-dense (MP, NP) slabs (MP % 32 == 0, NP % 128 == 0).
    d0 = desc0_ref[0].astype(jnp.bfloat16)            # (MP, d)
    d1 = desc1_ref[0].astype(jnp.bfloat16)            # (NP, d)
    wf = wf_ref[...]                                  # (d, DP) bf16
    bfuse = bfuse_ref[...]                            # (1, DP) f32

    # Fused projection + matchability head: one bf16 MXU matmul per side.
    proj0 = jnp.dot(d0, wf, preferred_element_type=jnp.float32) + bfuse   # (MP, DP)
    proj1 = jnp.dot(d1, wf, preferred_element_type=jnp.float32) + bfuse   # (NP, DP)

    scale = dim ** (-0.25)
    col0 = lax.broadcasted_iota(jnp.int32, proj0.shape, 1)
    col1 = lax.broadcasted_iota(jnp.int32, proj1.shape, 1)
    md0 = (jnp.where(col0 < dim, proj0, 0.0) * scale).astype(jnp.bfloat16)
    md1 = (jnp.where(col1 < dim, proj1, 0.0) * scale).astype(jnp.bfloat16)

    # Matchability logits: z0 is column `dim` of the fused projection; z1 is
    # produced directly in row orientation from the already-resident d1
    # (avoids a (NP,1)->(1,NP) sublane->lane transpose and any extra HBM pass).
    z0 = jnp.sum(jnp.where(col0 == dim, proj0, 0.0), axis=1, keepdims=True)   # (MP, 1)
    z1 = jnp.einsum('kd,nd->kn', wm_ref[...], d1,
                    preferred_element_type=jnp.float32) + bm_ref[...]         # (1, NP)

    # Similarity; zeroed pad columns make the valid (m, n) region exact.
    knp = jnp.einsum('md,nd->mn', md0, md1,
                     preferred_element_type=jnp.float32)                      # (MP, NP)
    kn_ref[0] = knp

    rows = lax.broadcasted_iota(jnp.int32, knp.shape, 0)
    cols = lax.broadcasted_iota(jnp.int32, knp.shape, 1)
    valid_r = rows < m
    valid_c = cols < n
    interior = valid_r & valid_c
    neg_inf = jnp.float32(-jnp.inf)

    # Double (masked) log-softmax; the exponentials are reused below so the
    # full-size exp(logscores) is never materialized.
    xm_c = jnp.where(valid_c, knp, neg_inf)
    row_max = jnp.max(xm_c, axis=1, keepdims=True)
    sh_c = xm_c - row_max
    e_row = jnp.exp(sh_c)
    row_sum = jnp.sum(e_row, axis=1, keepdims=True)
    scores0 = sh_c - jnp.log(row_sum)

    xm_r = jnp.where(valid_r, knp, neg_inf)
    col_max = jnp.max(xm_r, axis=0, keepdims=True)
    sh_r = xm_r - col_max
    e_col = jnp.exp(sh_r)
    col_sum = jnp.sum(e_col, axis=0, keepdims=True)
    scores1 = sh_r - jnp.log(col_sum)

    ls0 = _log_sigmoid(z0)                    # (MP, 1)
    ls1 = _log_sigmoid(z1)                    # (1, NP)

    inner = scores0 + scores1
    if multiply_matchability:
        inner = inner + ls0 + ls1
    right = ls0 - z0                          # log_sigmoid(-z0)
    bottom = ls1 - z1                         # log_sigmoid(-z1)
    logscores = jnp.where(
        interior, inner,
        jnp.where(valid_r, right, jnp.where(valid_c, bottom, 0.0)))
    logscores_ref[0] = logscores

    # Assignment probabilities without a second full-matrix exp:
    #   exp(scores0) = e_row / row_sum, exp(scores1) = e_col / col_sum.
    p = (e_row * _recip(row_sum)) * (e_col * _recip(col_sum))
    if multiply_matchability:
        p = p * jnp.exp(ls0) * jnp.exp(ls1)
    sc = jnp.where(interior, p, -1.0)

    # Mutual top-k + threshold.  k-th largest per row / column via repeated
    # masked max (value-based tie handling; torch.topk breaks ties by index).
    work = sc
    for t in range(topk):
        row_kth = jnp.max(work, axis=1, keepdims=True)
        if t + 1 < topk:
            work = jnp.where(work >= row_kth, neg_inf, work)
    work = sc
    for t in range(topk):
        col_kth = jnp.max(work, axis=0, keepdims=True)
        if t + 1 < topk:
            work = jnp.where(work >= col_kth, neg_inf, work)

    keep = (sc >= row_kth) & (sc >= col_kth) & (sc > jnp.float32(threshold))
    kassign_ref[0] = keep.astype(jnp.int8)


def match_assignment(desc0, desc1, params, *, threshold, topk,
                     multiply_matchability):
    wp_t, bp, wm_row, bm = params
    b, m, d = desc0.shape
    _, n, _ = desc1.shape
    assert topk >= 1 and topk <= min(m, n), "topk must be in [1, min(m, n)]"

    # Lane-dense output slabs: 32-row alignment also covers the int8 output
    # tiling; 128-column alignment gives unmasked full-block stores.
    m_pad = _round_up(m + 1, 32)
    n_pad = _round_up(n + 1, 128)
    d_pad = _round_up(d + 1, 128)

    # Zero-pad descriptors to the slab row counts so every in-kernel tensor is
    # tile-aligned and padded regions stay finite.
    # TODO(synk): drop this HBM pad by reading partial (over-sized) input
    # blocks directly once verified; it costs one extra HBM pass over desc0/1.
    desc0p = jnp.pad(desc0, ((0, 0), (0, m_pad - m), (0, 0)))
    desc1p = jnp.pad(desc1, ((0, 0), (0, n_pad - n), (0, 0)))

    # Fuse the matchability head into the projection: augmented RHS + bias.
    wf = jnp.zeros((d, d_pad), jnp.float32)
    wf = wf.at[:, :d].set(wp_t).at[:, d].set(wm_row[0])
    wf = wf.astype(jnp.bfloat16)
    bfuse = jnp.zeros((1, d_pad), jnp.float32)
    bfuse = bfuse.at[:, :d].set(bp).at[0, d].set(bm[0, 0])
    wm_bf16 = wm_row.astype(jnp.bfloat16)

    kernel = functools.partial(
        _match_kernel, dim=d, m=m, n=n, topk=topk, threshold=threshold,
        multiply_matchability=multiply_matchability)

    out_shape = (
        jax.ShapeDtypeStruct((b, m_pad, n_pad), jnp.float32),  # Kn slab
        jax.ShapeDtypeStruct((b, m_pad, n_pad), jnp.float32),  # logscores slab
        jax.ShapeDtypeStruct((b, m_pad, n_pad), jnp.int8),     # k_assignment slab
    )

    # Explicit VMEM budget: double-buffered ins/outs + live f32 temporaries.
    slab = m_pad * n_pad
    est = (2 * (slab * (4 + 4 + 1)
                + (m_pad + n_pad) * d * 4
                + d * d_pad * 2 + d_pad * 4 + d * 2 + 4)
           + 12 * slab * 4
           + (2 << 20))
    vmem_limit = int(min(max(est, 32 * 1024 * 1024), 127 * 1024 * 1024))
    # TODO(synk): for LightGlue-scale m, n (>~1k) add an m-tile grid axis with
    # an online column softmax / top-k so the working set fits v7x's 64 MiB.

    grid_spec = pltpu.PrefetchScalarGridSpec(
        num_scalar_prefetch=0,
        grid=(b,),
        in_specs=[
            pl.BlockSpec((1, m_pad, d), lambda i: (i, 0, 0)),
            pl.BlockSpec((1, n_pad, d), lambda i: (i, 0, 0)),
            pl.BlockSpec((d, d_pad), lambda i: (0, 0)),
            pl.BlockSpec((1, d_pad), lambda i: (0, 0)),
            pl.BlockSpec((1, d), lambda i: (0, 0)),
            pl.BlockSpec((1, 1), lambda i: (0, 0)),
        ],
        out_specs=[
            pl.BlockSpec((1, m_pad, n_pad), lambda i: (i, 0, 0)),
            pl.BlockSpec((1, m_pad, n_pad), lambda i: (i, 0, 0)),
            pl.BlockSpec((1, m_pad, n_pad), lambda i: (i, 0, 0)),
        ],
    )
    knp, logscores_p, kassign_p = pl.pallas_call(
        kernel,
        out_shape=out_shape,
        grid_spec=grid_spec,
        compiler_params=pltpu.CompilerParams(
            dimension_semantics=("parallel",),
            vmem_limit_bytes=vmem_limit),
    )(desc0p, desc1p, wf, bfuse, wm_bf16, bm)

    Kn = knp[:, :m, :n]
    logscores = logscores_p[:, :m + 1, :n + 1]
    k_assignment = kassign_p[:, :m, :n].astype(jnp.bool_)
    # mimic torch's .squeeze() on the returned tensors
    return jnp.squeeze(Kn), jnp.squeeze(logscores), jnp.squeeze(k_assignment)


def reference(desc0, desc1, params, *, threshold, topk, multiply_matchability):
    """Pure-JAX reference for the PyTorch forward, mirroring the kernel's
    bf16-operand / f32-accumulation matmul strategy."""
    wp_t, bp, wm_row, bm = params
    d = desc0.shape[-1]
    f32 = jnp.float32
    d0 = desc0.astype(jnp.bfloat16)
    d1 = desc1.astype(jnp.bfloat16)
    wp_bf = wp_t.astype(jnp.bfloat16)
    wm_bf = wm_row.astype(jnp.bfloat16)
    scale = d ** (-0.25)
    md0 = (jnp.einsum('bmd,de->bme', d0, wp_bf, preferred_element_type=f32) + bp) * scale
    md1 = (jnp.einsum('bnd,de->bne', d1, wp_bf, preferred_element_type=f32) + bp) * scale
    md0 = md0.astype(jnp.bfloat16)
    md1 = md1.astype(jnp.bfloat16)
    Kn = jnp.einsum('bmd,bnd->bmn', md0, md1, preferred_element_type=f32)
    z0 = jnp.einsum('bmd,kd->bmk', d0, wm_bf, preferred_element_type=f32) + bm  # (b,m,1)
    z1 = jnp.einsum('bnd,kd->bnk', d1, wm_bf, preferred_element_type=f32) + bm  # (b,n,1)
    cert = jax.nn.log_sigmoid(z0) + jnp.swapaxes(jax.nn.log_sigmoid(z1), 1, 2)
    s0 = jax.nn.log_softmax(Kn, axis=2)
    s1 = jax.nn.log_softmax(Kn, axis=1)
    inner = s0 + s1 + (cert if multiply_matchability else 0.0)
    b, m, n = Kn.shape
    logscores = jnp.zeros((b, m + 1, n + 1), f32)
    logscores = logscores.at[:, :m, :n].set(inner)
    logscores = logscores.at[:, :m, n].set(jax.nn.log_sigmoid(-z0)[..., 0])
    logscores = logscores.at[:, m, :n].set(jax.nn.log_sigmoid(-z1)[..., 0])
    sc = jnp.exp(logscores)[:, :m, :n]
    row_kth = lax.top_k(sc, topk)[0][..., -1:]
    col_kth = jnp.swapaxes(
        lax.top_k(jnp.swapaxes(sc, 1, 2), topk)[0][..., -1:], 1, 2)
    src = (sc >= row_kth) & (sc > threshold)
    tar = (sc >= col_kth) & (sc > threshold)
    corr = src & tar
    return jnp.squeeze(Kn), jnp.squeeze(logscores), jnp.squeeze(corr)


def _topk_assignment(logscores, threshold, topk):
    """torch find_k_assignment semantics applied to (b, m+1, n+1) log-scores."""
    sc = jnp.exp(logscores)[:, :-1, :-1]
    row_kth = lax.top_k(sc, topk)[0][..., -1:]
    col_kth = jnp.swapaxes(
        lax.top_k(jnp.swapaxes(sc, 1, 2), topk)[0][..., -1:], 1, 2)
    src = (sc >= row_kth) & (sc > threshold)
    tar = (sc >= col_kth) & (sc > threshold)
    return src & tar


if __name__ == "__main__":
    b, m, n, d = 2, 8, 12, 32
    threshold = 1e-3
    topk = 3
    multiply_matchability = True

    key = jax.random.PRNGKey(0)
    k1, k2, k3, k4, k5, k6 = jax.random.split(key, 6)
    bound = 1.0 / (d ** 0.5)
    # final_proj: Linear(d, d) -> weight pre-transposed so y = x @ wp_t + bp
    wp_t = jax.random.uniform(k1, (d, d), jnp.float32, -bound, bound)
    bp = jax.random.uniform(k2, (1, d), jnp.float32, -bound, bound)
    # matchability: Linear(d, 1)
    wm_row = jax.random.uniform(k3, (1, d), jnp.float32, -bound, bound)
    bm = jax.random.uniform(k4, (1, 1), jnp.float32, -bound, bound)
    params = (wp_t, bp, wm_row, bm)

    desc0 = jax.random.normal(k5, (b, m, d), jnp.float32)
    desc1 = jax.random.normal(k6, (b, n, d), jnp.float32)

    kn, logscores, k_assignment = match_assignment(
        desc0, desc1, params, threshold=threshold, topk=topk,
        multiply_matchability=multiply_matchability)
    jax.block_until_ready((kn, logscores, k_assignment))

    kn_ref, logscores_ref, _ = reference(
        desc0, desc1, params, threshold=threshold, topk=topk,
        multiply_matchability=multiply_matchability)

    # bf16 matmul operands -> bf16-appropriate tolerances for the dense scores.
    assert jnp.allclose(kn, kn_ref, atol=5e-3, rtol=5e-3)
    assert jnp.allclose(logscores, logscores_ref, atol=5e-3, rtol=5e-3)

    # Validate the mutual top-k / threshold logic exactly against the torch
    # find_k_assignment semantics, fed with the kernel's own log-scores so the
    # bit-exact check is insensitive to bf16 rounding of near-tied scores.
    ls_b = logscores if logscores.ndim == 3 else logscores[None]
    ka_b = k_assignment if k_assignment.ndim == 3 else k_assignment[None]
    ka_check = _topk_assignment(ls_b, threshold, topk)
    assert bool(jnp.all(ka_b == ka_check))

    print("KERNEL_OK")
</pallas_src>

<mosaic_0001>
module attributes {stable_mosaic.version = 11 : i64} {
  func.func @_match_kernel(%arg0: i32, %arg1: memref<1x32x32xf32, #tpu.memory_space<vmem>>, %arg2: memref<1x128x32xf32, #tpu.memory_space<vmem>>, %arg3: memref<32x128xbf16, #tpu.memory_space<vmem>>, %arg4: memref<1x128xf32, #tpu.memory_space<vmem>>, %arg5: memref<1x32xbf16, #tpu.memory_space<vmem>>, %arg6: memref<1x1xf32, #tpu.memory_space<vmem>>, %arg7: memref<1x32x128xf32, #tpu.memory_space<vmem>>, %arg8: memref<1x32x128xf32, #tpu.memory_space<vmem>>, %arg9: memref<1x32x128xi8, #tpu.memory_space<vmem>>) attributes {dimension_semantics = [#tpu.dimension_semantics<parallel>], iteration_bounds = array<i64: 2>, scalar_prefetch = 0 : i64, scratch_operands = 0 : i64, tpu.core_type = #tpu.core_type<tc>, window_params = [{transform_indices = @transform_0, window_bounds = array<i64: 1, 32, 32>}, {transform_indices = @transform_1, window_bounds = array<i64: 1, 128, 32>}, {pipeline_mode = #tpu.pipeline_mode<synchronous>, transform_indices = @transform_2, window_bounds = array<i64: 32, 128>}, {pipeline_mode = #tpu.pipeline_mode<synchronous>, transform_indices = @transform_3, window_bounds = array<i64: 1, 128>}, {pipeline_mode = #tpu.pipeline_mode<synchronous>, transform_indices = @transform_4, window_bounds = array<i64: 1, 32>}, {pipeline_mode = #tpu.pipeline_mode<synchronous>, transform_indices = @transform_5, window_bounds = array<i64: 1, 1>}, {transform_indices = @transform_6, window_bounds = array<i64: 1, 32, 128>}, {transform_indices = @transform_7, window_bounds = array<i64: 1, 32, 128>}, {transform_indices = @transform_8, window_bounds = array<i64: 1, 32, 128>}]} {
    %c0 = arith.constant 0 : index
    %c0_0 = arith.constant 0 : index
    %c0_1 = arith.constant 0 : index
    %0 = vector.load %arg1[%c0, %c0_0, %c0_1] : memref<1x32x32xf32, #tpu.memory_space<vmem>>, vector<1x32x32xf32>
    %1 = vector.shape_cast %0 : vector<1x32x32xf32> to vector<32x32xf32>
    %2 = arith.truncf %1 : vector<32x32xf32> to vector<32x32xbf16>
    %c0_2 = arith.constant 0 : index
    %c0_3 = arith.constant 0 : index
    %c0_4 = arith.constant 0 : index
    %3 = vector.load %arg2[%c0_2, %c0_3, %c0_4] : memref<1x128x32xf32, #tpu.memory_space<vmem>>, vector<1x128x32xf32>
    %4 = vector.shape_cast %3 : vector<1x128x32xf32> to vector<128x32xf32>
    %5 = arith.truncf %4 : vector<128x32xf32> to vector<128x32xbf16>
    %c0_5 = arith.constant 0 : index
    %c0_6 = arith.constant 0 : index
    %6 = vector.load %arg3[%c0_5, %c0_6] : memref<32x128xbf16, #tpu.memory_space<vmem>>, vector<32x128xbf16>
    %c0_7 = arith.constant 0 : index
    %c0_8 = arith.constant 0 : index
    %7 = vector.load %arg4[%c0_7, %c0_8] : memref<1x128xf32, #tpu.memory_space<vmem>>, vector<1x128xf32>
    %cst = arith.constant dense<0.000000e+00> : vector<32x128xf32>
    %8 = tpu.matmul %2, %6, %cst {dimension_numbers = #tpu.dot_dimension_numbers<[1], [0], [0], [1], [0, 0, 1, 1], [], []>} : vector<32x32xbf16>, vector<32x128xbf16>, vector<32x128xf32> -> vector<32x128xf32>
    %9 = vector.broadcast %7 : vector<1x128xf32> to vector<32x128xf32>
    %10 = arith.addf %8, %9 : vector<32x128xf32>
    %cst_9 = arith.constant dense<0.000000e+00> : vector<128x128xf32>
    %11 = tpu.matmul %5, %6, %cst_9 {dimension_numbers = #tpu.dot_dimension_numbers<[1], [0], [0], [1], [0, 0, 1, 1], [], []>} : vector<128x32xbf16>, vector<32x128xbf16>, vector<128x128xf32> -> vector<128x128xf32>
    %12 = vector.broadcast %7 : vector<1x128xf32> to vector<128x128xf32>
    %13 = arith.addf %11, %12 : vector<128x128xf32>
    %14 = tpu.iota {dimensions = array<i32: 1>} : vector<32x128xi32>
    %15 = tpu.iota {dimensions = array<i32: 1>} : vector<128x128xi32>
    %c32_i32 = arith.constant 32 : i32
    %16 = vector.broadcast %c32_i32 : i32 to vector<32x128xi32>
    %17 = arith.cmpi slt, %14, %16 : vector<32x128xi32>
    %cst_10 = arith.constant 0.000000e+00 : f32
    %18 = vector.broadcast %cst_10 : f32 to vector<32x128xf32>
    %19 = arith.select %17, %10, %18 : vector<32x128xi1>, vector<32x128xf32>
    %cst_11 = arith.constant 0.420448214 : f32
    %20 = vector.broadcast %cst_11 : f32 to vector<32x128xf32>
    %21 = arith.mulf %19, %20 : vector<32x128xf32>
    %22 = arith.truncf %21 : vector<32x128xf32> to vector<32x128xbf16>
    %c32_i32_12 = arith.constant 32 : i32
    %23 = vector.broadcast %c32_i32_12 : i32 to vector<128x128xi32>
    %24 = arith.cmpi slt, %15, %23 : vector<128x128xi32>
    %cst_13 = arith.constant 0.000000e+00 : f32
    %25 = vector.broadcast %cst_13 : f32 to vector<128x128xf32>
    %26 = arith.select %24, %13, %25 : vector<128x128xi1>, vector<128x128xf32>
    %cst_14 = arith.constant 0.420448214 : f32
    %27 = vector.broadcast %cst_14 : f32 to vector<128x128xf32>
    %28 = arith.mulf %26, %27 : vector<128x128xf32>
    %29 = arith.truncf %28 : vector<128x128xf32> to vector<128x128xbf16>
    %c32_i32_15 = arith.constant 32 : i32
    %30 = vector.broadcast %c32_i32_15 : i32 to vector<32x128xi32>
    %31 = arith.cmpi eq, %14, %30 : vector<32x128xi32>
    %cst_16 = arith.constant 0.000000e+00 : f32
    %32 = vector.broadcast %cst_16 : f32 to vector<32x128xf32>
    %33 = arith.select %31, %10, %32 : vector<32x128xi1>, vector<32x128xf32>
    %cst_17 = arith.constant dense<0.000000e+00> : vector<32xf32>
    %34 = vector.multi_reduction <add>, %33, %cst_17 [1] : vector<32x128xf32> to vector<32xf32>
    %35 = vector.shape_cast %34 : vector<32xf32> to vector<32x1xf32>
    %c0_18 = arith.constant 0 : index
    %c0_19 = arith.constant 0 : index
    %36 = vector.load %arg5[%c0_18, %c0_19] : memref<1x32xbf16, #tpu.memory_space<vmem>>, vector<1x32xbf16>
    "tpu.trace_start"() <{level = 10 : i32, message = "kd,nd->kn"}> : () -> ()
    %cst_20 = arith.constant dense<0.000000e+00> : vector<1x128xf32>
    %37 = tpu.matmul %36, %5, %cst_20 {dimension_numbers = #tpu.dot_dimension_numbers<[1], [1], [0], [0], [0, 0, 1, 0], [], []>} : vector<1x32xbf16>, vector<128x32xbf16>, vector<1x128xf32> -> vector<1x128xf32>
    "tpu.trace_stop"() : () -> ()
    %c0_21 = arith.constant 0 : index
    %c0_22 = arith.constant 0 : index
    %38 = vector.load %arg6[%c0_21, %c0_22] : memref<1x1xf32, #tpu.memory_space<vmem>>, vector<1x1xf32>
    %39 = vector.broadcast %38 : vector<1x1xf32> to vector<1x128xf32>
    %40 = arith.addf %37, %39 : vector<1x128xf32>
    "tpu.trace_start"() <{level = 10 : i32, message = "md,nd->mn"}> : () -> ()
    %cst_23 = arith.constant dense<0.000000e+00> : vector<32x128xf32>
    %41 = tpu.matmul %22, %29, %cst_23 {dimension_numbers = #tpu.dot_dimension_numbers<[1], [1], [0], [0], [0, 0, 1, 0], [], []>} : vector<32x128xbf16>, vector<128x128xbf16>, vector<32x128xf32> -> vector<32x128xf32>
    "tpu.trace_stop"() : () -> ()
    %c0_24 = arith.constant 0 : index
    %c0_25 = arith.constant 0 : index
    %c0_26 = arith.constant 0 : index
    %42 = vector.load %arg7[%c0_24, %c0_25, %c0_26] : memref<1x32x128xf32, #tpu.memory_space<vmem>>, vector<1x32x128xf32>
    %43 = vector.shape_cast %42 : vector<1x32x128xf32> to vector<32x128xf32>
    %44 = vector.shape_cast %41 : vector<32x128xf32> to vector<1x32x128xf32>
    tpu.vector_store %arg7[%c0_24, %c0_25, %c0_26], %44 {strides = array<i32>} : memref<1x32x128xf32, #tpu.memory_space<vmem>>, vector<1x32x128xf32>,
    %45 = tpu.iota {dimensions = array<i32: 0>} : vector<32x128xi32>
    %46 = tpu.iota {dimensions = array<i32: 1>} : vector<32x128xi32>
    %c8_i32 = arith.constant 8 : i32
    %47 = vector.broadcast %c8_i32 : i32 to vector<32x128xi32>
    %48 = arith.cmpi slt, %45, %47 : vector<32x128xi32>
    %c12_i32 = arith.constant 12 : i32
    %49 = vector.broadcast %c12_i32 : i32 to vector<32x128xi32>
    %50 = arith.cmpi slt, %46, %49 : vector<32x128xi32>
    %51 = arith.andi %48, %50 : vector<32x128xi1>
    %cst_27 = arith.constant 0xFF800000 : f32
    %52 = vector.broadcast %cst_27 : f32 to vector<32x128xf32>
    %53 = arith.select %50, %41, %52 : vector<32x128xi1>, vector<32x128xf32>
    %cst_28 = arith.constant dense<0xFF800000> : vector<32xf32>
    %54 = vector.multi_reduction <maximumf>, %53, %cst_28 [1] : vector<32x128xf32> to vector<32xf32>
    %55 = vector.shape_cast %54 : vector<32xf32> to vector<32x1xf32>
    %56 = vector.broadcast %55 : vector<32x1xf32> to vector<32x128xf32>
    %57 = arith.subf %53, %56 : vector<32x128xf32>
    %58 = math.exp %57 : vector<32x128xf32>
    %cst_29 = arith.constant dense<0.000000e+00> : vector<32xf32>
    %59 = vector.multi_reduction <add>, %58, %cst_29 [1] : vector<32x128xf32> to vector<32xf32>
    %60 = vector.shape_cast %59 : vector<32xf32> to vector<32x1xf32>
    %61 = math.log %60 : vector<32x1xf32>
    %62 = vector.broadcast %61 : vector<32x1xf32> to vector<32x128xf32>
    %63 = arith.subf %57, %62 : vector<32x128xf32>
    %cst_30 = arith.constant 0xFF800000 : f32
    %64 = vector.broadcast %cst_30 : f32 to vector<32x128xf32>
    %65 = arith.select %48, %41, %64 : vector<32x128xi1>, vector<32x128xf32>
    %cst_31 = arith.constant dense<0xFF800000> : vector<128xf32>
    %66 = vector.multi_reduction <maximumf>, %65, %cst_31 [0] : vector<32x128xf32> to vector<128xf32>
    %67 = vector.shape_cast %66 : vector<128xf32> to vector<1x128xf32>
    %68 = vector.broadcast %67 : vector<1x128xf32> to vector<32x128xf32>
    %69 = arith.subf %65, %68 : vector<32x128xf32>
    %70 = math.exp %69 : vector<32x128xf32>
    %cst_32 = arith.constant dense<0.000000e+00> : vector<128xf32>
    %71 = vector.multi_reduction <add>, %70, %cst_32 [0] : vector<32x128xf32> to vector<128xf32>
    %72 = vector.shape_cast %71 : vector<128xf32> to vector<1x128xf32>
    %73 = math.log %72 : vector<1x128xf32>
    %74 = vector.broadcast %73 : vector<1x128xf32> to vector<32x128xf32>
    %75 = arith.subf %69, %74 : vector<32x128xf32>
    %cst_33 = arith.constant 0.000000e+00 : f32
    %76 = vector.broadcast %cst_33 : f32 to vector<32x1xf32>
    %77 = arith.minimumf %35, %76 : vector<32x1xf32>
    %78 = math.absf %35 : vector<32x1xf32>
    %cst_34 = arith.constant 0.000000e+00 : f32
    %79 = vector.broadcast %cst_34 : f32 to vector<32x1xf32>
    %80 = arith.subf %79, %78 : vector<32x1xf32>
    %81 = math.exp %80 : vector<32x1xf32>
    %82 = math.log1p %81 : vector<32x1xf32>
    %83 = arith.subf %77, %82 : vector<32x1xf32>
    %cst_35 = arith.constant 0.000000e+00 : f32
    %84 = vector.broadcast %cst_35 : f32 to vector<1x128xf32>
    %85 = arith.minimumf %40, %84 : vector<1x128xf32>
    %86 = math.absf %40 : vector<1x128xf32>
    %cst_36 = arith.constant 0.000000e+00 : f32
    %87 = vector.broadcast %cst_36 : f32 to vector<1x128xf32>
    %88 = arith.subf %87, %86 : vector<1x128xf32>
    %89 = math.exp %88 : vector<1x128xf32>
    %90 = math.log1p %89 : vector<1x128xf32>
    %91 = arith.subf %85, %90 : vector<1x128xf32>
    %92 = arith.addf %63, %75 : vector<32x128xf32>
    %93 = vector.broadcast %83 : vector<32x1xf32> to vector<32x128xf32>
    %94 = arith.addf %92, %93 : vector<32x128xf32>
    %95 = vector.broadcast %91 : vector<1x128xf32> to vector<32x128xf32>
    %96 = arith.addf %94, %95 : vector<32x128xf32>
    %97 = arith.subf %83, %35 : vector<32x1xf32>
    %98 = arith.subf %91, %40 : vector<1x128xf32>
    %cst_37 = arith.constant 0.000000e+00 : f32
    %99 = vector.shape_cast %98 : vector<1x128xf32> to vector<1x128xf32>
    %100 = vector.broadcast %99 : vector<1x128xf32> to vector<32x128xf32>
    %101 = vector.broadcast %cst_37 : f32 to vector<32x128xf32>
    %102 = arith.select %50, %100, %101 : vector<32x128xi1>, vector<32x128xf32>
    %103 = vector.shape_cast %97 : vector<32x1xf32> to vector<32x1xf32>
    %104 = vector.broadcast %103 : vector<32x1xf32> to vector<32x128xf32>
    %105 = arith.select %48, %104, %102 : vector<32x128xi1>, vector<32x128xf32>
    %106 = arith.select %51, %96, %105 : vector<32x128xi1>, vector<32x128xf32>
    %c0_38 = arith.constant 0 : index
    %c0_39 = arith.constant 0 : index
    %c0_40 = arith.constant 0 : index
    %107 = vector.load %arg8[%c0_38, %c0_39, %c0_40] : memref<1x32x128xf32, #tpu.memory_space<vmem>>, vector<1x32x128xf32>
    %108 = vector.shape_cast %107 : vector<1x32x128xf32> to vector<32x128xf32>
    %109 = vector.shape_cast %106 : vector<32x128xf32> to vector<1x32x128xf32>
    tpu.vector_store %arg8[%c0_38, %c0_39, %c0_40], %109 {strides = array<i32>} : memref<1x32x128xf32, #tpu.memory_space<vmem>>, vector<1x32x128xf32>,
    %110 = tpu.reciprocal %60 {approx = true} : vector<32x1xf32> -> vector<32x1xf32>
    %111 = arith.mulf %60, %110 : vector<32x1xf32>
    %cst_41 = arith.constant 2.000000e+00 : f32
    %112 = vector.broadcast %cst_41 : f32 to vector<32x1xf32>
    %113 = arith.subf %112, %111 : vector<32x1xf32>
    %114 = arith.mulf %110, %113 : vector<32x1xf32>
    %115 = vector.broadcast %114 : vector<32x1xf32> to vector<32x128xf32>
    %116 = arith.mulf %58, %115 : vector<32x128xf32>
    %117 = tpu.reciprocal %72 {approx = true} : vector<1x128xf32> -> vector<1x128xf32>
    %118 = arith.mulf %72, %117 : vector<1x128xf32>
    %cst_42 = arith.constant 2.000000e+00 : f32
    %119 = vector.broadcast %cst_42 : f32 to vector<1x128xf32>
    %120 = arith.subf %119, %118 : vector<1x128xf32>
    %121 = arith.mulf %117, %120 : vector<1x128xf32>
    %122 = vector.broadcast %121 : vector<1x128xf32> to vector<32x128xf32>
    %123 = arith.mulf %70, %122 : vector<32x128xf32>
    %124 = arith.mulf %116, %123 : vector<32x128xf32>
    %125 = math.exp %83 : vector<32x1xf32>
    %126 = vector.broadcast %125 : vector<32x1xf32> to vector<32x128xf32>
    %127 = arith.mulf %124, %126 : vector<32x128xf32>
    %128 = math.exp %91 : vector<1x128xf32>
    %129 = vector.broadcast %128 : vector<1x128xf32> to vector<32x128xf32>
    %130 = arith.mulf %127, %129 : vector<32x128xf32>
    %cst_43 = arith.constant -1.000000e+00 : f32
    %131 = vector.broadcast %cst_43 : f32 to vector<32x128xf32>
    %132 = arith.select %51, %130, %131 : vector<32x128xi1>, vector<32x128xf32>
    %cst_44 = arith.constant dense<0xFF800000> : vector<32xf32>
    %133 = vector.multi_reduction <maximumf>, %132, %cst_44 [1] : vector<32x128xf32> to vector<32xf32>
    %134 = vector.shape_cast %133 : vector<32xf32> to vector<32x1xf32>
    %135 = vector.broadcast %134 : vector<32x1xf32> to vector<32x128xf32>
    %136 = arith.cmpf oge, %132, %135 : vector<32x128xf32>
    %cst_45 = arith.constant 0xFF800000 : f32
    %137 = vector.broadcast %cst_45 : f32 to vector<32x128xf32>
    %138 = arith.select %136, %137, %132 : vector<32x128xi1>, vector<32x128xf32>
    %cst_46 = arith.constant dense<0xFF800000> : vector<32xf32>
    %139 = vector.multi_reduction <maximumf>, %138, %cst_46 [1] : vector<32x128xf32> to vector<32xf32>
    %140 = vector.shape_cast %139 : vector<32xf32> to vector<32x1xf32>
    %141 = vector.broadcast %140 : vector<32x1xf32> to vector<32x128xf32>
    %142 = arith.cmpf oge, %138, %141 : vector<32x128xf32>
    %cst_47 = arith.constant 0xFF800000 : f32
    %143 = vector.broadcast %cst_47 : f32 to vector<32x128xf32>
    %144 = arith.select %142, %143, %138 : vector<32x128xi1>, vector<32x128xf32>
    %cst_48 = arith.constant dense<0xFF800000> : vector<32xf32>
    %145 = vector.multi_reduction <maximumf>, %144, %cst_48 [1] : vector<32x128xf32> to vector<32xf32>
    %146 = vector.shape_cast %145 : vector<32xf32> to vector<32x1xf32>
    %cst_49 = arith.constant dense<0xFF800000> : vector<128xf32>
    %147 = vector.multi_reduction <maximumf>, %132, %cst_49 [0] : vector<32x128xf32> to vector<128xf32>
    %148 = vector.shape_cast %147 : vector<128xf32> to vector<1x128xf32>
    %149 = vector.broadcast %148 : vector<1x128xf32> to vector<32x128xf32>
    %150 = arith.cmpf oge, %132, %149 : vector<32x128xf32>
    %cst_50 = arith.constant 0xFF800000 : f32
    %151 = vector.broadcast %cst_50 : f32 to vector<32x128xf32>
    %152 = arith.select %150, %151, %132 : vector<32x128xi1>, vector<32x128xf32>
    %cst_51 = arith.constant dense<0xFF800000> : vector<128xf32>
    %153 = vector.multi_reduction <maximumf>, %152, %cst_51 [0] : vector<32x128xf32> to vector<128xf32>
    %154 = vector.shape_cast %153 : vector<128xf32> to vector<1x128xf32>
    %155 = vector.broadcast %154 : vector<1x128xf32> to vector<32x128xf32>
    %156 = arith.cmpf oge, %152, %155 : vector<32x128xf32>
    %cst_52 = arith.constant 0xFF800000 : f32
    %157 = vector.broadcast %cst_52 : f32 to vector<32x128xf32>
    %158 = arith.select %156, %157, %152 : vector<32x128xi1>, vector<32x128xf32>
    %cst_53 = arith.constant dense<0xFF800000> : vector<128xf32>
    %159 = vector.multi_reduction <maximumf>, %158, %cst_53 [0] : vector<32x128xf32> to vector<128xf32>
    %160 = vector.shape_cast %159 : vector<128xf32> to vector<1x128xf32>
    %161 = vector.broadcast %146 : vector<32x1xf32> to vector<32x128xf32>
    %162 = arith.cmpf oge, %132, %161 : vector<32x128xf32>
    %163 = vector.broadcast %160 : vector<1x128xf32> to vector<32x128xf32>
    %164 = arith.cmpf oge, %132, %163 : vector<32x128xf32>
    %165 = arith.andi %162, %164 : vector<32x128xi1>
    %cst_54 = arith.constant 1.000000e-03 : f32
    %166 = vector.broadcast %cst_54 : f32 to vector<32x128xf32>
    %167 = arith.cmpf ogt, %132, %166 : vector<32x128xf32>
    %168 = arith.andi %165, %167 : vector<32x128xi1>
    %169 = arith.extui %168 : vector<32x128xi1> to vector<32x128xi8>
    %c0_55 = arith.constant 0 : index
    %c0_56 = arith.constant 0 : index
    %c0_57 = arith.constant 0 : index
    %170 = vector.load %arg9[%c0_55, %c0_56, %c0_57] : memref<1x32x128xi8, #tpu.memory_space<vmem>>, vector<1x32x128xi8>
    %171 = vector.shape_cast %170 : vector<1x32x128xi8> to vector<32x128xi8>
    %172 = vector.shape_cast %169 : vector<32x128xi8> to vector<1x32x128xi8>
    tpu.vector_store %arg9[%c0_55, %c0_56, %c0_57], %172 {strides = array<i32>} : memref<1x32x128xi8, #tpu.memory_space<vmem>>, vector<1x32x128xi8>,
    return
  }
  func.func @transform_0(%arg0: i32) -> (i32, i32, i32) {
    %c0_i32 = arith.constant 0 : i32
    %c0_i32_0 = arith.constant 0 : i32
    %c0_i32_1 = arith.constant 0 : i32
    return %arg0, %c0_i32, %c0_i32_0 : i32, i32, i32
  }
  func.func @transform_1(%arg0: i32) -> (i32, i32, i32) {
    %c0_i32 = arith.constant 0 : i32
    %c0_i32_0 = arith.constant 0 : i32
    %c0_i32_1 = arith.constant 0 : i32
    return %arg0, %c0_i32, %c0_i32_0 : i32, i32, i32
  }
  func.func @transform_2(%arg0: i32) -> (i32, i32) {
    %c0_i32 = arith.constant 0 : i32
    %c0_i32_0 = arith.constant 0 : i32
    %c0_i32_1 = arith.constant 0 : i32
    return %c0_i32, %c0_i32_0 : i32, i32
  }
  func.func @transform_3(%arg0: i32) -> (i32, i32) {
    %c0_i32 = arith.constant 0 : i32
    %c0_i32_0 = arith.constant 0 : i32
    %c0_i32_1 = arith.constant 0 : i32
    return %c0_i32, %c0_i32_0 : i32, i32
  }
  func.func @transform_4(%arg0: i32) -> (i32, i32) {
    %c0_i32 = arith.constant 0 : i32
    %c0_i32_0 = arith.constant 0 : i32
    %c0_i32_1 = arith.constant 0 : i32
    return %c0_i32, %c0_i32_0 : i32, i32
  }
  func.func @transform_5(%arg0: i32) -> (i32, i32) {
    %c0_i32 = arith.constant 0 : i32
    %c0_i32_0 = arith.constant 0 : i32
    %c0_i32_1 = arith.constant 0 : i32
    return %c0_i32, %c0_i32_0 : i32, i32
  }
  func.func @transform_6(%arg0: i32) -> (i32, i32, i32) {
    %c0_i32 = arith.constant 0 : i32
    %c0_i32_0 = arith.constant 0 : i32
    %c0_i32_1 = arith.constant 0 : i32
    return %arg0, %c0_i32, %c0_i32_0 : i32, i32, i32
  }
  func.func @transform_7(%arg0: i32) -> (i32, i32, i32) {
    %c0_i32 = arith.constant 0 : i32
    %c0_i32_0 = arith.constant 0 : i32
    %c0_i32_1 = arith.constant 0 : i32
    return %arg0, %c0_i32, %c0_i32_0 : i32, i32, i32
  }
  func.func @transform_8(%arg0: i32) -> (i32, i32, i32) {
    %c0_i32 = arith.constant 0 : i32
    %c0_i32_0 = arith.constant 0 : i32
    %c0_i32_1 = arith.constant 0 : i32
    return %arg0, %c0_i32, %c0_i32_0 : i32, i32, i32
  }
}

</mosaic_0001>

<bundles_post_ra>
// kernel: tpu_custom_call.1
= control target key start
LH: loop header
LB: loop body
LE: loop exit
PB: predicated region body
PF: predicated region fallthrough
CT: control target
= control target key end

     0   :  { %s1862_s0 = inlined_call_operand.vmem [shape: f32[2,32,32], index: 0, kind: input, shape index: {}]   ;;  %s1863_s1 = inlined_call_operand.vmem [shape: f32[2,128,32], index: 1, kind: input, shape index: {}]   ;;  %s1864_s2 = inlined_call_operand.vmem [shape: bf16[32,128], index: 2, kind: input, shape index: {}]   ;;  %s1865_s3 = inlined_call_operand.vmem [shape: f32[1,128], index: 3, kind: input, shape index: {}]   ;;  %s1866_s4 = inlined_call_operand.vmem [shape: bf16[1,32], index: 4, kind: input, shape index: {}]   ;;  %s1867_s5 = inlined_call_operand.<no memory space> [shape: f32[1,1], index: 5, kind: input, shape index: {}]   ;;  %s1868_s6 = inlined_call_operand.hbm [shape: f32[2,32,128], index: 6, kind: output, shape index: {0}]   ;;  %s1869_s7 = inlined_call_operand.hbm [shape: f32[2,32,128], index: 7, kind: output, shape index: {1}]   ;;  %s1870_s8 = inlined_call_operand.hbm [shape: s8[2,32,128], index: 8, kind: output, shape index: {2}]  }
   0x1   :  { %1872 = sst [smem:[#allocation10_spill]] %s1862_s0  ;;  %v14_v0 = vstv %s1867_s5 }
   0x2   :  { %1873 = sst [smem:[#allocation11_spill]] %s1863_s1  ;;  %15 = vst [vmem:[#allocation2] sm:$0x1] %v14_v0 }
   0x3   :  { %16 = vsyncpa [#allocation4], 0 }
   0x4   :  { %18 = vsyncpa [#allocation4 + $0x1], 0 }
   0x5   :  { %19 = vsyncpa [#allocation6], 0 }
   0x6   :  { %21 = vsyncpa [#allocation6 + $0x1], 0  ;;  %s1493_s29 = smov 0   ;;  %s1495_s30 = smov 0  }
   0x7   :  { %s1497_s9 = smov 0   ;;  %s1499_s10 = smov 0  }
   0x8 LB: > { %s1514_s5 = sadd.s32 4294967295, %s1438_s10   ;;  %s1871_s11 = sadd.s32 4294967294, %s1438_s10   ;;  %s1438_s10 = sphi %s1499_s10, %s1882_s10   ;;  %s1434_s9 = sphi %s1497_s9, %s1881_s9   ;;  %s1430_s30 = sphi %s1495_s30, %s1880_s30   ;;  %s1426_s29 = sphi %s1493_s29, %s1879_s29  }
   0x9   : > { %s1518_s12 = sadd.s32 1, %s1438_s10   ;;  %s170_s13 = sadd.s32 1, %s1434_s9 }
   0xa   : > { %s167_s14 = ssub.s32 %s1438_s10, %s1518_s12  ;;  %p180_p0 = scmp.ne.s32.totalorder %s1434_s9, %s1430_s30 }
   0xb   : > { %p168_p1 = scmp.eq.s32.totalorder %s167_s14, 0  ;;  %p181_p2 = scmp.eq.s32.totalorder %s1514_s5, 1 }
   0xc   : > { %p186_p3 = scmp.ne.s32.totalorder %s1430_s30, %s1426_s29  ;;  %p187_p4 = scmp.eq.s32.totalorder %s1871_s11, 1 }
   0xd   : > { %s1531_s15 = scalar_select %p168_p1, %s1434_s9, %s170_s13  }
   0xe   : > { %p1533_p5 = por %p181_p2, %p180_p0  ;;  %p1537_p6 = por %p187_p4, %p186_p3 }
   0xf   : > { %p1177_p7 = scmp.ge.s32.totalorder %s1438_s10, 1  ;;  %p285_p8 = scmp.lt.s32.totalorder %s1438_s10, 3 }
  0x11   : > { %p286_p9 = pnand %p1177_p7, %p285_p8 }
  0x12   : > { %p334_p10 = scmp.lt.s32.totalorder (!%p286_p9), %s1514_s5, 1  ;;  %s1876_s1 = sld [smem:[#allocation11_spill]] (!%p286_p9) }
  0x13   : > { %289 = sbr.rel (%p286_p9) target bundleno = 1063 (0x427), region = 44  ;;  %s1877_s0 = sld [smem:[#allocation10_spill]] (!%p286_p9) }
  0x14   : > { %s1709_s20 = sand.u32 (!%p286_p9), 1, %s1430_s30   ;;  %s1230_s28 = sshll.u32 (!%p286_p9), %s1514_s5, 5 }
  0x15   : > { %s1178_s21 = sshll.u32 (!%p286_p9), %s1709_s20, 5  ;;  %s985_s13 = sand.u32 (!%p286_p9), 1, %s1514_s5  }
  0x16   : > { %s1754_s25 = scalar_lea.vmem (!%p286_p9), [#allocation5], %s1178_s21  ;;  %s1019_s19 = scalar_lea.hbm (!%p286_p9), %s1869_s7, %s1230_s28 }
  0x17   : > { %s1022_s11 = sshll.u32 (!%p286_p9), %s1019_s19, 4  ;;  %s1023_s11 = int_to_ptr.hbm [resolvable:$true] %s1022_s11 }
  0x18   : > { %v1229_v1 = vld [vmem:[%s1864_s2 + $0x8] sm:$0xff]  ;;  %v1228_v2 = vld [vmem:[%s1864_s2] sm:$0xff]  ;;  %s335_s22 = scalar_select %p334_p10, %s1514_s5, 1  ;;  %vm397_vm0 = vcmask 261120   ;;  %v496_v33 = vlaneseq }
  0x19   : > { %1232 = vmatpush.bf16.msra.mxu1 %v1229_v1  ;;  %410 = vmatpush.bf16.msra.mxu0 %v1229_v1  ;;  %v1614_v35 = vld [vmem:[%s1865_s3] ss:$0 sm:$0xff] }
  0x1a   : > { %s1227_s23 = sshll.u32 %s335_s22, 7  ;;  %s1226_s24 = sshll.u32 %s335_s22, 5  ;;  %v1609_v34 = vand.u32 127, %v496_v33 }
  0x1b   : > { %s1554_s27 = scalar_lea.vmem %s1876_s1, %s1227_s23  ;;  %s338_s14 = scalar_lea.vmem %s1877_s0, %s1226_s24 }
  0x1c   : > { %v359_v3 = vld [vmem:[%s1554_s27 + $0x30] sm:$0xff]  ;;  %v360_v4 = vld [vmem:[%s1554_s27 + $0x38] sm:$0xff]  ;;  %v347_v5 = vld [vmem:[%s338_s14] sm:$0xff]  ;;  %vm549_vm1 = vcmp.eq.s32.totalorder %v1609_v34, 32  ;;  %vm498_vm2 = vcmp.lt.s32.totalorder %v1609_v34, 32  ;;  %vm618_vm3 = vcmp.lt.s32.totalorder %v1609_v34, 12  ;;  %s1002_s24 = scalar_lea.hbm %s1868_s6, %s1230_s28 }
  0x1d   : > { %1233 = vmatpush.bf16.msra.mxu1 %v1228_v2  ;;  %411 = vmatpush.bf16.msra.mxu0 %v1228_v2  ;;  %v1561_v6 = vpack.c.bf16 %v360_v4, %v359_v3  ;;  %v348_v7 = vld [vmem:[%s338_s14 + $0x8] sm:$0xff]  ;;  %v361_v9 = vld [vmem:[%s1554_s27 + $0x40] sm:$0xff]  ;;  %v349_v11 = vld [vmem:[%s338_s14 + $0x10] sm:$0xff]  ;;  %s1719_s22 = scalar_lea.vmem [#allocation3], %s1178_s21  ;;  %s1330_s0 = sshra.s32 %s1023_s11, 4  ;;  %s1331_s0 = int_to_ptr.hbm [resolvable:$true] %s1330_s0 }
  0x1e   : > { %v351_v8 = vpack.c.bf16 %v348_v7, %v347_v5  ;;  %v362_v10 = vld [vmem:[%s1554_s27 + $0x48] sm:$0xff]  ;;  %v350_v12 = vld [vmem:[%s338_s14 + $0x18] sm:$0xff]  ;;  %v363_v15 = vld [vmem:[%s1554_s27 + $0x50] sm:$0xff]  ;;  %s1003_s26 = sshll.u32 %s1719_s22, 4  ;;  %s1332_s1 = scalar_lea.hbm %s1331_s0, 32  ;;  %s1776_s26 = int_to_ptr.vmem [resolvable:$true] %s1003_s26 }
  0x1f   : > { %v1568_v13 = vpack.c.bf16 %v362_v10, %v361_v9  ;;  %v352_v14 = vpack.c.bf16 %v350_v12, %v349_v11  ;;  %v364_v16 = vld [vmem:[%s1554_s27 + $0x58] sm:$0xff]  ;;  %v353_v17 = vld [vmem:[%s1554_s27] sm:$0xff]  ;;  %v354_v18 = vld [vmem:[%s1554_s27 + $0x8] sm:$0xff]  ;;  %p1333_p11 = scmp.ne.s32.totalorder %s1331_s0, %s1332_s1  ;;  %s1336_s28 = scalar_lea.hbm %s1869_s7, 64 }
  0x20   : > { %1198 = vmatmul.msk.bf16.vlgmr.msra.gmra.mxu1 %vm397_vm0, %v1561_v6  ;;  %1193 = vmatmul.msk.bf16.vlgmr.msra.gmra.mxu0 %vm397_vm0, %v351_v8  ;;  %v1577_v19 = vpack.c.bf16 %v364_v16, %v363_v15  ;;  %v1579_v20 = vpack.c.bf16 %v354_v18, %v353_v17  ;;  %v365_v21 = vld [vmem:[%s1554_s27 + $0x60] sm:$0xff]  ;;  %v366_v22 = vld [vmem:[%s1554_s27 + $0x68] sm:$0xff]  ;;  %v355_v23 = vld [vmem:[%s1554_s27 + $0x10] sm:$0xff]  ;;  %p1337_p0 = scmp.lt.s32.totalorder %s1331_s0, %s1869_s7  ;;  %p1338_p1 = scmp.lt.s32.totalorder %s1336_s28, %s1332_s1 }
  0x21   : > { %453 = vmatpush.bf16.msrb.mxu0 %v1229_v1  ;;  %v356_v24 = vld [vmem:[%s1554_s27 + $0x18] sm:$0xff]  ;;  %v1589_v25 = vpack.c.bf16 %v366_v22, %v365_v21  ;;  %v367_v27 = vld [vmem:[%s1554_s27 + $0x70] sm:$0xff]  ;;  %v357_v29 = vld [vmem:[%s1554_s27 + $0x20] sm:$0xff]  ;;  %p1334_p12 = pnand %p1333_p11, %p1533_p5 }
  0x22   : > { %v1591_v26 = vpack.c.bf16 %v356_v24, %v355_v23  ;;  %v368_v28 = vld [vmem:[%s1554_s27 + $0x78] sm:$0xff]  ;;  %v358_v30 = vld [vmem:[%s1554_s27 + $0x28] sm:$0xff]  ;;  %s1020_s27 = sshll.u32 %s1754_s25, 4  ;;  %p1339_p2 = por %p1338_p1, %p1337_p0  ;;  %s1778_s27 = int_to_ptr.vmem [resolvable:$true] %s1020_s27 }
  0x23   : > { %v1601_v31 = vpack.c.bf16 %v368_v28, %v367_v27  ;;  %v1603_v32 = vpack.c.bf16 %v358_v30, %v357_v29  ;;  %p1335_p13 = pneg %p1334_p12 }
  0x25   : > { %454 = vmatpush.bf16.msrb.mxu0 %v1228_v2  ;;  %p1340_p3 = pnand %p1339_p2, %p1335_p13 }
  0x30   : > { %1199 = vmatmul.msk.bf16.gmra.mxu1 %vm397_vm0, %v1568_v13  ;;  %1194 = vmatmul.msk.bf16.gmra.mxu0 %vm397_vm0, %v352_v14 }
  0x40   : > { %1200 = vmatmul.msk.bf16.gmra.mxu1 %vm397_vm0, %v1577_v19  ;;  %1195 = vmatmul.msk.bf16.vlgmr.msrb.gmra.mxu0 %vm397_vm0, %v1579_v20 }
  0x50   : > { %1201 = vmatmul.msk.bf16.gmra.mxu1 %vm397_vm0, %v1589_v25  ;;  %1196 = vmatmul.msk.bf16.gmra.mxu0 %vm397_vm0, %v1591_v26 }
  0x60   : > { %1202 = vmatmul.msk.bf16.gmra.mxu1 %vm397_vm0, %v1601_v31  ;;  %1197 = vmatmul.msk.bf16.gmra.mxu0 %vm397_vm0, %v1603_v32 }
  0x9d   : > { %v471_v36 = vpop.f32.mrf.mxu1  ;;  %v413_v37 = vpop.f32.mrf.mxu0 }
  0x9e   : > { %v414_v38 = vadd.f32 %v1614_v35, %v413_v37  ;;  %v472_v40 = vadd.f32 %v1614_v35, %v471_v36 }
  0xa0   : > { %v550_v39 = vsel %vm549_vm1, %v414_v38, 0.0  ;;  %v499_v42 = vsel %vm498_vm2, %v414_v38, 0.0  ;;  %v515_v43 = vsel %vm498_vm2, %v472_v40, 0.0 }
  0xa1   : > { %554 = vadd.xlane.f32.xlu1 %v550_v39  ;;  %v1628_v48 = vmul.f32 0.4204482, %v499_v42  ;;  %v1630_v49 = vmul.f32 0.4204482, %v515_v43 }
  0xa5   : > { %v473_v41 = vpop.f32.mrf.mxu1  ;;  %v415_v45 = vpop.f32.mrf.mxu0 }
  0xa6   : > { %v474_v44 = vadd.f32 %v1614_v35, %v473_v41  ;;  %v416_v46 = vadd.f32 %v1614_v35, %v415_v45 }
  0xa8   : > { %v516_v47 = vsel %vm498_vm2, %v474_v44, 0.0  ;;  %v500_v51 = vsel %vm498_vm2, %v416_v46, 0.0 }
  0xa9   : > { %v1632_v50 = vmul.f32 0.4204482, %v516_v47  ;;  %v1636_v52 = vmul.f32 0.4204482, %v500_v51 }
  0xab   : > { %v544_v53 = vpack.c.bf16 %v1632_v50, %v1630_v49  ;;  %v507_v54 = vpack.c.bf16 %v1636_v52, %v1628_v48  ;;  %v436_v48 = vsel %vm397_vm0, %v1568_v13, 0  ;;  %v430_v52 = vsel %vm397_vm0, %v1603_v32, 0  ;;  %v562_v32 = vld [vmem:[%s1866_s4] sm:$0x1] }
  0xad   : > { %v476_v55 = vpop.f32.mrf.mxu1  ;;  %v418_v56 = vpop.f32.mrf.mxu0 }
  0xae   : > { %v419_v57 = vadd.f32 %v1614_v35, %v418_v56  ;;  %v477_v58 = vadd.f32 %v1614_v35, %v476_v55 }
  0xb0   : > { %v501_v60 = vsel %vm498_vm2, %v419_v57, 0.0  ;;  %v517_v61 = vsel %vm498_vm2, %v477_v58, 0.0 }
  0xb1   : > { %v1652_v2 = vmul.f32 0.4204482, %v501_v60  ;;  %v533_v3 = vmul.f32 0.4204482, %v517_v61 }
  0xb5   : > { %v478_v59 = vpop.f32.mrf.mxu1  ;;  %v420_v63 = vpop.f32.mrf.mxu0 }
  0xb6   : > { %v479_v62 = vadd.f32 %v1614_v35, %v478_v59  ;;  %v421_v0 = vadd.f32 %v1614_v35, %v420_v63 }
  0xb8   : > { %v518_v1 = vsel %vm498_vm2, %v479_v62, 0.0  ;;  %v502_v5 = vsel %vm498_vm2, %v421_v0, 0.0 }
  0xb9   : > { %v534_v4 = vmul.f32 0.4204482, %v518_v1  ;;  %v1656_v7 = vmul.f32 0.4204482, %v502_v5 }
  0xbb   : > { %v545_v8 = vpack.c.bf16 %v534_v4, %v533_v3  ;;  %v508_v9 = vpack.c.bf16 %v1656_v7, %v1652_v2  ;;  %v427_v2 = vsel %vm397_vm0, %v1591_v26, 0  ;;  %v563_v7 = vld [vmem:[#allocation2] sm:$0x1] }
  0xbd   : > { %v481_v10 = vpop.f32.mrf.mxu1  ;;  %v456_v14 = vpop.f32.mrf.mxu0 }
  0xbe   : > { %v482_v43 = vadd.f32 %v1614_v35, %v481_v10 }
  0xc0   : > { %v519_v46 = vsel %vm498_vm2, %v482_v43, 0.0 }
  0xc1   : > { %v535_v49 = vmul.f32 0.4204482, %v519_v46 }
  0xc5   : > { %v483_v11 = vpop.f32.mrf.mxu1  ;;  %v458_v17 = vpop.f32.mrf.mxu0 }
  0xc6   : > { %v484_v40 = vadd.f32 %v1614_v35, %v483_v11 }
  0xc8   : > { %v520_v45 = vsel %vm498_vm2, %v484_v40, 0.0 }
  0xc9   : > { %v536_v47 = vmul.f32 0.4204482, %v520_v45 }
  0xcb   : > { %v546_v51 = vpack.c.bf16 %v536_v47, %v535_v49 }
  0xcd   : > { %v486_v12 = vpop.f32.mrf.mxu1  ;;  %v461_v24 = vpop.f32.mrf.mxu0 }
  0xce   : > { %v487_v33 = vadd.f32 %v1614_v35, %v486_v12  ;;  %v462_v62 = vadd.f32 %v1614_v35, %v461_v24 }
  0xd0   : > { %v521_v38 = vsel %vm498_vm2, %v487_v33, 0.0  ;;  %v511_v1 = vsel %vm498_vm2, %v462_v62, 0.0 }
  0xd1   : > { %v537_v41 = vmul.f32 0.4204482, %v521_v38  ;;  %v527_v4 = vmul.f32 0.4204482, %v511_v1 }
  0xd5   : > { %v488_v15 = vpop.f32.mrf.mxu1  ;;  %v463_v42 = vpop.f32.mrf.mxu0 }
  0xd6   : > { %v489_v27 = vadd.f32 %v1614_v35, %v488_v15  ;;  %v464_v63 = vadd.f32 %v1614_v35, %v463_v42 }
  0xd8   : > { %v522_v37 = vsel %vm498_vm2, %v489_v27, 0.0  ;;  %v512_v3 = vsel %vm498_vm2, %v464_v63, 0.0 }
  0xd9   : > { %v538_v39 = vmul.f32 0.4204482, %v522_v37  ;;  %v528_v5 = vmul.f32 0.4204482, %v512_v3 }
  0xdb   : > { %v547_v44 = vpack.c.bf16 %v538_v39, %v537_v41  ;;  %v542_v10 = vpack.c.bf16 %v528_v5, %v527_v4 }
  0xdd   : > { %v491_v16 = vpop.f32.mrf.mxu1  ;;  %v466_v50 = vpop.f32.mrf.mxu0 }
  0xde   : > { %v492_v18 = vadd.f32 %v1614_v35, %v491_v16  ;;  %v467_v56 = vadd.f32 %v1614_v35, %v466_v50 }
  0xe0   : > { %v523_v23 = vsel %vm498_vm2, %v492_v18, 0.0  ;;  %v513_v58 = vsel %vm498_vm2, %v467_v56, 0.0 }
  0xe1   : > { %v539_v29 = vmul.f32 0.4204482, %v523_v23  ;;  %v529_v60 = vmul.f32 0.4204482, %v513_v58 }
  0xe5   : > { %v493_v21 = vpop.f32.mrf.mxu1  ;;  %v468_v55 = vpop.f32.mrf.mxu0 }
  0xe6   : > { %v494_v22 = vadd.f32 %v1614_v35, %v493_v21  ;;  %v469_v57 = vadd.f32 %v1614_v35, %v468_v55  ;;  %v424_v21 = vsel %vm397_vm0, %v1579_v20, 0 }
  0xe8   : > { %v524_v28 = vsel %vm498_vm2, %v494_v22, 0.0  ;;  %v514_v59 = vsel %vm498_vm2, %v469_v57, 0.0 }
  0xe9   : > { %v540_v30 = vmul.f32 0.4204482, %v524_v28  ;;  %v530_v61 = vmul.f32 0.4204482, %v514_v59 }
  0xeb   : > { %v548_v36 = vpack.c.bf16 %v540_v30, %v539_v29  ;;  %v543_v0 = vpack.c.bf16 %v530_v61, %v529_v60 }
  0xed   : > { %586 = vmatpush.bf16.xpose.msra.mxu3 %v548_v36 }
  0xf5   : > { %587 = vmatpush.bf16.xpose.msra.mxu3 %v547_v44 }
  0xfd   : > { %588 = vmatpush.bf16.xpose.msra.mxu3 %v546_v51 }
 0x105   : > { %589 = vmatpush.bf16.xpose.msra.mxu3 %v545_v8  ;;  %v457_v8 = vadd.f32 %v1614_v35, %v456_v14  ;;  %v442_v14 = vsel %vm397_vm0, %v1589_v25, 0 }
 0x107   : > { %v509_v11 = vsel %vm498_vm2, %v457_v8, 0.0 }
 0x108   : > { %v525_v15 = vmul.f32 0.4204482, %v509_v11 }
 0x10d   : > { %590 = vmatpush.bf16.xpose.msra.mxu3 %v544_v53  ;;  %v459_v53 = vadd.f32 %v1614_v35, %v458_v17  ;;  %v445_v35 = vsel %vm397_vm0, %v1601_v31, 0  ;;  %v439_v17 = vsel %vm397_vm0, %v1577_v19, 0  ;;  %v433_v19 = vsel %vm397_vm0, %v1561_v6, 0 }
 0x10e   : > { %573 = vmatpush.bf16.xpose.msra.mxu2 %v445_v35 }
 0x10f   : > { %v510_v12 = vsel %vm498_vm2, %v459_v53, 0.0 }
 0x110   : > { %v526_v16 = vmul.f32 0.4204482, %v510_v12 }
 0x112   : > { %v541_v18 = vpack.c.bf16 %v526_v16, %v525_v15 }
 0x114   : > { %v555_v8 = vpop.xlane.xlu1 %554 }
 0x115   : > { %591 = vmatpush.bf16.xpose.msra.mxu3 %v543_v0 }
 0x116   : > { %574 = vmatpush.bf16.xpose.msra.mxu2 %v442_v14 }
 0x11d   : > { %592 = vmatpush.bf16.xpose.msra.mxu3 %v542_v10  ;;  %v711_v10 = vand.u32 2147483647, %v555_v8 }
 0x11e   : > { %575 = vmatpush.bf16.xpose.msra.mxu2 %v439_v17 }
 0x11f   : > { %v715_v12 = vsub.f32 0.0, %v711_v10 }
 0x121   : > { %v719_v16 = vmul.f32 1.442695, %v715_v12 }
 0x125   : > { %593 = vmatpush.bf16.xpose.msra.mxu3 %v541_v18 }
 0x126   : > { %576 = vmatpush.bf16.xpose.msra.mxu2 %v436_v48 }
 0x12c   : > { %594 = vmatmul.bf16.vlgmr.msra.gmra.mxu3 %v507_v54 }
 0x12e   : > { %577 = vmatpush.bf16.xpose.msra.mxu2 %v433_v19 }
 0x136   : > { %578 = vmatpush.bf16.xpose.msra.mxu2 %v430_v52 }
 0x13c   : > { %599 = vmatmul.bf16.gmra.mxu3 %v508_v9  ;;  %v1440_v9 = vmov 0  }
 0x13d   : > { %1288 = vset.pattern.permute.xlu0 %v1440_v9 }
 0x13e   : > { %579 = vmatpush.bf16.xpose.msra.mxu2 %v427_v2 }
 0x146   : > { %580 = vmatpush.bf16.xpose.msra.mxu2 %v424_v21 }
 0x14d   : > { %1203 = vmatmul.msk.bf16.vlgmr.msra.gmra.mxu2 %vm397_vm0, %v562_v32  ;;  %v707_v32 = vmin.f32 %v555_v8, 0.0 }
 0x1af   : > { %v595_v31 = vpop.f32.mrf.mxu3 }
 0x1b0   : > { %v623_v25 = vsel %vm618_vm3, %v595_v31, -inf  ;;  %605 = vst [vmem:[%s1719_s22] sm:$0xff] %v595_v31  ;;  %v674_v20 = vrot.slane %v595_v31, 4 }
 0x1b1   : > { %627 = vmax.xlane.f32.xlu0 %v623_v25 }
 0x1b2   : > { %v675_v29 = vmax.f32 %v595_v31, %v674_v20 }
 0x1b4   : > { %v676_v36 = vrot.slane %v675_v29, 2 }
 0x1b6   : > { %v677_v39 = vmax.f32 %v675_v29, %v676_v36 }
 0x1b7   : > { %v597_v13 = vpop.f32.mrf.mxu3 }
 0x1b8   : > { %606 = vst [vmem:[%s1719_s22 + $0x8] sm:$0xff] %v597_v13  ;;  %v678_v42 = vrot.slane %v677_v39, 1 }
 0x1ba   : > { %v679_v44 = vmax.f32 %v677_v39, %v678_v42 }
 0x1bc   : > { %v1744_v47 = vsub.f32 %v595_v31, %v679_v44  ;;  %v681_v50 = vsub.f32 -inf, %v679_v44 }
 0x1be   : > { %v684_v55 = vmul.f32 1.442695, %v1744_v47  ;;  %v686_v58 = vmul.f32 1.442695, %v681_v50 }
 0x1bf   : > { %v600_v54 = vpop.f32.mrf.mxu3 }
 0x1c0   : > { %607 = vst [vmem:[%s1719_s22 + $0x10] sm:$0xff] %v600_v54 }
 0x1c5   : > { %566 = vperm.xlu0 %1288, %v563_v7  }
 0x1c7   : > { %v602_v6 = vpop.f32.mrf.mxu3 }
 0x1c8   : > { %608 = vst [vmem:[%s1719_s22 + $0x18] sm:$0xff] %v602_v6  ;;  %s1005_s22 = sshll.u32 %s1002_s24, 4  ;;  %s1788_s22 = int_to_ptr.hbm [resolvable:$true] %s1005_s22 }
 0x1d0   : > { %v582_v30 = vpop.f32.mrf.mxu2 }
 0x1d8   : > { %v584_v41 = vpop.f32.mrf.mxu2 }
 0x224   : > { %v628_v22 = vpop.xlane.xlu0 %627 }
 0x225   : > { %v1738_v26 = vsub.f32 %v623_v25, %v628_v22 }
 0x227   : > { %v639_v23 = vmul.f32 1.442695, %v1738_v26 }
 0x229   : > { %1290 = vpow2.f32 %v639_v23 }
 0x22f   : > { %v1741_v24 = vpop.eup %1290 }
 0x230   : > { %647 = vadd.xlane.f32.xlu1 %v1741_v24 }
 0x237   : > { %v567_v27 = vpop.permute.xlu0 %566 }
 0x238   : > { %v569_v28 = vperm.slane %v567_v27, 0 }
 0x23a   : > { %v583_v33 = vadd.f32 %v582_v30, %v569_v28 }
 0x23c   : > { %v768_v37 = vand.u32 2147483647, %v583_v33  ;;  %v767_v59 = vmin.f32 %v583_v33, 0.0 }
 0x23e   : > { %v769_v38 = vsub.f32 0.0, %v768_v37 }
 0x240   : > { %v770_v40 = vmul.f32 1.442695, %v769_v38 }
 0x242   : > { %1292 = vpow2.f32 %v770_v40 }
 0x248   : > { %v1293_v43 = vpop.eup %1292 }
 0x249   : > { %v772_v45 = vadd.f32 1.0, %v1293_v43  ;;  %v775_v46 = vmul.f32 -0.5, %v1293_v43  ;;  %v778_v51 = vand.u32 2147483647, %v1293_v43 }
 0x24b   : > { %1294 = vlog2.f32 %v772_v45  ;;  %v776_v49 = vadd.f32 1.0, %v775_v46  ;;  %vm779_vm4 = vcmp.lt.f32.partialorder %v778_v51, 0.0004427343 }
 0x24c   : > { %1296 = vpow2.f32 %v684_v55 }
 0x24d   : > { %v777_v56 = vmul.f32 %v1293_v43, %v776_v49  ;;  %1298 = vpow2.f32 %v686_v58 }
 0x24e   : > { %1300 = vpow2.f32 %v719_v16 }
 0x251   : > { %v1295_v57 = vpop.eup %1294 }
 0x252   : > { %v774_v60 = vmul.f32 0.6931472, %v1295_v57  ;;  %v1297_v1 = vpop.eup %1296 }
 0x253   : > { %v1299_v3 = vpop.eup %1298 }
 0x254   : > { %v780_v61 = vsel %vm779_vm4, %v777_v56, %v774_v60  ;;  %v692_v5 = vadd.f32 %v1299_v3, %v1297_v1  ;;  %v1301_v17 = vpop.eup %1300 }
 0x255   : > { %v1747_v62 = vsub.f32 %v767_v59, %v780_v61  ;;  %v727_v48 = vadd.f32 1.0, %v1301_v17  ;;  %v730_v19 = vmul.f32 -0.5, %v1301_v17  ;;  %v733_v54 = vand.u32 2147483647, %v1301_v17 }
 0x256   : > { %v693_v53 = vadd.f32 %v1299_v3, %v692_v5 }
 0x257   : > { %v799_v63 = vsub.f32 %v1747_v62, %v583_v33  ;;  %1302 = vlog2.f32 %v727_v48  ;;  %v731_v13 = vadd.f32 1.0, %v730_v19  ;;  %vm734_vm5 = vcmp.lt.f32.partialorder %v733_v54, 0.0004427343 }
 0x258   : > { %v694_v11 = vadd.f32 %v1299_v3, %v693_v53  ;;  %v858_v29 = vmul.f32 1.442695, %v1747_v62  ;;  %v790_v46 = vperm.slane %v1747_v62, 0 }
 0x259   : > { %v800_v0 = vperm.slane %v799_v63, 0  ;;  %v732_v7 = vmul.f32 %v1301_v17, %v731_v13 }
 0x25a   : > { %v695_v15 = vrot.slane %v694_v11, 4 }
 0x25b   : > { %v801_v4 = vsel %vm618_vm3, %v800_v0, 0.0 }
 0x25c   : > { %811 = vst [vmem:[%s1754_s25 + $0x8] sm:$0xff] %v801_v4  ;;  %v696_v18 = vadd.f32 %v695_v15, %v694_v11 }
 0x25d   : > { %812 = vst [vmem:[%s1754_s25 + $0x10] sm:$0xff] %v801_v4  ;;  %v1303_v52 = vpop.eup %1302 }
 0x25e   : > { %813 = vst [vmem:[%s1754_s25 + $0x18] sm:$0xff] %v801_v4  ;;  %v697_v35 = vrot.slane %v696_v18, 2  ;;  %v729_v2 = vmul.f32 0.6931472, %v1303_v52 }
 0x260   : > { %v698_v14 = vadd.f32 %v697_v35, %v696_v18  ;;  %v735_v23 = vsel %vm734_vm5, %v732_v7, %v729_v2 }
 0x261   : > { %v763_v20 = vsub.f32 %v707_v32, %v735_v23 }
 0x262   : > { %v699_v31 = vrot.slane %v698_v14, 1 }
 0x263   : > { %v846_v37 = vmul.f32 1.442695, %v763_v20  ;;  %v795_v56 = vsub.f32 %v763_v20, %v555_v8 }
 0x264   : > { %v700_v25 = vadd.f32 %v699_v31, %v698_v14 }
 0x266   : > { %1304 = vrcp.f32 %v700_v25 }
 0x267   : > { %1306 = vlog2.f32 %v700_v25 }
 0x26c   : > { %v1305_v6 = vpop.eup %1304 }
 0x26d   : > { %v1307_v22 = vpop.eup %1306  ;;  %v835_v27 = vmul.f32 %v1305_v6, %v700_v25 }
 0x26e   : > { %v702_v28 = vmul.f32 0.6931472, %v1307_v22 }
 0x26f   : > { %v836_v33 = vsub.f32 2.0, %v835_v27 }
 0x270   : > { %v703_v40 = vsub.f32 %v1744_v47, %v702_v28 }
 0x271   : > { %v837_v42 = vmul.f32 %v1305_v6, %v836_v33 }
 0x273   : > { %v838_v50 = vmul.f32 %v1297_v1, %v837_v42 }
 0x2a3   : > { %v648_v21 = vpop.xlane.xlu1 %647 }
 0x2a4   : > { %1308 = vlog2.f32 %v648_v21 }
 0x2a5   : > { %1310 = vrcp.f32 %v648_v21 }
 0x2a6   : > { %1312 = vpow2.f32 %v858_v29 }
 0x2a7   : > { %1314 = vpow2.f32 %v846_v37 }
 0x2aa   : > { %v1309_v30 = vpop.eup %1308 }
 0x2ab   : > { %v1311_v36 = vpop.eup %1310  ;;  %v656_v38 = vmul.f32 0.6931472, %v1309_v30 }
 0x2ac   : > { %v818_v39 = vmul.f32 %v1311_v36, %v648_v21  ;;  %v1313_v55 = vpop.eup %1312 }
 0x2ad   : > { %v663_v41 = vsub.f32 %v1738_v26, %v656_v38  ;;  %v1315_v58 = vpop.eup %1314  ;;  %v860_v59 = vperm.slane %v1313_v55, 0 }
 0x2ae   : > { %v822_v43 = vsub.f32 2.0, %v818_v39 }
 0x2af   : > { %v782_v44 = vadd.f32 %v703_v40, %v663_v41 }
 0x2b0   : > { %v826_v45 = vmul.f32 %v1311_v36, %v822_v43 }
 0x2b1   : > { %v786_v49 = vadd.f32 %v782_v44, %v763_v20 }
 0x2b2   : > { %v830_v51 = vmul.f32 %v1741_v24, %v826_v45 }
 0x2b3   : > { %v791_v47 = vadd.f32 %v790_v46, %v786_v49 }
 0x2b4   : > { %v842_v57 = vmul.f32 %v838_v50, %v830_v51 }
 0x2b5   : > { %v806_v26 = vsel %vm618_vm3, %v791_v47, %v795_v56 }
 0x2b6   : > { %810 = vst [vmem:[%s1754_s25] sm:$0xff] %v806_v26  ;;  %v854_v60 = vmul.f32 %v1315_v58, %v842_v57  ;;  %s1790_s25 = scalar_lea.sflag [#allocation6], %s985_s13 }
 0x2b8   : > { %v861_v61 = vmul.f32 %v860_v59, %v854_v60 }
 0x2ba   : > { %v1769_v62 = vsel %vm618_vm3, %v861_v61, -1.0 }
 0x2bb   : > { %869 = vmax.xlane.f32.xlu2 %v1769_v62 }
 0x32e   : > { %v870_v24 = vpop.xlane.xlu2 %869 }
 0x32f   : > { %vm877_vm6 = vcmp.ge.f32.partialorder %v1769_v62, %v870_v24 }
 0x330   : > { %v881_v63 = vsel %vm877_vm6, -inf, %v1769_v62 }
 0x331   : > { %885 = vmax.xlane.f32.xlu2 %v881_v63 }
 0x3a4   : > { %v886_v34 = vpop.xlane.xlu2 %885 }
 0x3a5   : > { %vm893_vm7 = vcmp.ge.f32.partialorder %v881_v63, %v886_v34 }
 0x3a6   : > { %v897_v0 = vsel %vm893_vm7, -inf, %v881_v63 }
 0x3a7   : > { %901 = vmax.xlane.f32.xlu1 %v897_v0 }
 0x3a8   : > { %1343 = shalt.err (!%p1340_p3)
}
 0x3a9   : > { %s1441_s13 = smov 128   ;;  %s1442_s23 = smov 8  }
 0x3aa   : > { %1235 = dma.vmem_to_hbm [thread:$0]  (%p1533_p5), %s1778_s27, 512, %s1023_s11, %s1790_s25, %s1441_s13, %s1441_s13, %s1442_s23  }
 0x3ab   : > { %s981_s24 = scalar_lea.sflag [#allocation4], %s1709_s20  ;;  %s1358_s14 = sshra.s32 %s1788_s22, 4  ;;  %s1359_s14 = int_to_ptr.hbm [resolvable:$true] %s1358_s14 }
 0x3ac   : > { %s1360_s18 = scalar_lea.hbm %s1359_s14, 32  ;;  %s1364_s28 = scalar_lea.hbm %s1868_s6, 64 }
 0x3ad   : > { %p1361_p4 = scmp.ne.s32.totalorder %s1359_s14, %s1360_s18  ;;  %p1365_p9 = scmp.lt.s32.totalorder %s1359_s14, %s1868_s6 }
 0x3ae   : > { %p1366_p10 = scmp.lt.s32.totalorder %s1364_s28, %s1360_s18 }
 0x3af   : > { %p1362_p7 = pnand %p1361_p4, %p1533_p5 }
 0x3b0   : > { %p1367_p11 = por %p1366_p10, %p1365_p9 }
 0x3b1   : > { %p1363_p8 = pneg %p1362_p7 }
 0x3b3   : > { %p1368_p12 = pnand %p1367_p11, %p1363_p8 }
 0x3b5   : > { %1371 = shalt.err (!%p1368_p12)
}
 0x3b6   : > { %1234 = dma.vmem_to_hbm [thread:$0]  (%p1533_p5), %s1776_s26, 512, %s1788_s22, %s981_s24, %s1441_s13, %s1441_s13, %s1442_s23   ;;  %v909_v1 = vmax.f32 %v1769_v62, -1.0  ;;  %v1443_v15 = vmov -1.0   ;;  %vm1444_vm12 = vmmov 0   ;;  %vm964_vm1 = vcmp.gt.f32.partialorder %v1769_v62, 0.001 }
 0x3b7   : > { %s1180_s11 = sshll.u32 %s1709_s20, 3  ;;  %s1223_s26 = sshll.u32 %s1514_s5, 3  ;;  %vm973_vm13 = vmpackc.low %vm1444_vm12, %vm1444_vm12 }
 0x3b8   : > { %v911_v3 = vmax.f32 %v909_v1, -1.0  ;;  %s1035_s13 = scalar_lea.hbm %s1870_s8, %s1223_s26  ;;  %v975_v20 = vsel %vm973_vm13, 16711935, %v1440_v9  ;;  %s333_s5 = scalar_lea.vmem [#allocation7], %s1180_s11 }
 0x3b9   : > { %s1037_s20 = sshll.u32 %s333_s5, 4  ;;  %s1039_s23 = sshll.u32 %s1035_s13, 4  ;;  %s1038_s20 = int_to_ptr.vmem [resolvable:$true] %s1037_s20  ;;  %s1040_s23 = int_to_ptr.hbm [resolvable:$true] %s1039_s23 }
 0x3ba   : > { %v912_v4 = vrot.slane %v911_v3, 4  ;;  %s1386_s24 = sshra.s32 %s1040_s23, 4  ;;  %s1392_s1 = scalar_lea.hbm %s1870_s8, 16  ;;  %s1387_s24 = int_to_ptr.hbm [resolvable:$true] %s1386_s24 }
 0x3bb   : > { %s1388_s14 = scalar_lea.hbm %s1387_s24, 8  ;;  %p1393_p2 = scmp.lt.s32.totalorder %s1387_s24, %s1870_s8 }
 0x3bc   : > { %v913_v5 = vmax.f32 %v911_v3, %v912_v4  ;;  %p1389_p13 = scmp.ne.s32.totalorder %s1387_s24, %s1388_s14  ;;  %p1394_p3 = scmp.lt.s32.totalorder %s1392_s1, %s1388_s14 }
 0x3be   : > { %v914_v8 = vrot.slane %v913_v5, 2  ;;  %p1390_p0 = pnand %p1389_p13, %p1533_p5  ;;  %p1395_p4 = por %p1394_p3, %p1393_p2 }
 0x3c0   : > { %v915_v53 = vmax.f32 %v913_v5, %v914_v8  ;;  %p1391_p1 = pneg %p1390_p0 }
 0x3c2   : > { %v916_v10 = vrot.slane %v915_v53, 1  ;;  %p1396_p7 = pnand %p1395_p4, %p1391_p1 }
 0x3c4   : > { %v917_v11 = vmax.f32 %v915_v53, %v916_v10 }
 0x3c6   : > { %vm918_vm8 = vcmp.ge.f32.partialorder %v1769_v62, %v917_v11  ;;  %vm1207_vm9 = vcmp.le.f32.partialorder %v917_v11, -1.0 }
 0x3c7   : > { %v922_v12 = vsel %vm918_vm8, -inf, %v1769_v62  ;;  %v923_v16 = vsel %vm1207_vm9, -inf, %v1443_v15 }
 0x3c8   : > { %v926_v18 = vmax.f32 %v922_v12, %v923_v16 }
 0x3ca   : > { %v928_v35 = vmax.f32 %v926_v18, %v923_v16 }
 0x3cc   : > { %v929_v14 = vrot.slane %v928_v35, 4 }
 0x3ce   : > { %v930_v17 = vmax.f32 %v928_v35, %v929_v14 }
 0x3d0   : > { %v931_v48 = vrot.slane %v930_v17, 2 }
 0x3d2   : > { %v932_v31 = vmax.f32 %v930_v17, %v931_v48 }
 0x3d4   : > { %v933_v25 = vrot.slane %v932_v31, 1 }
 0x3d6   : > { %v934_v19 = vmax.f32 %v932_v31, %v933_v25 }
 0x3d8   : > { %vm935_vm10 = vcmp.ge.f32.partialorder %v922_v12, %v934_v19  ;;  %vm936_vm11 = vcmp.ge.f32.partialorder %v923_v16, %v934_v19 }
 0x3d9   : > { %v939_v13 = vsel %vm935_vm10, -inf, %v922_v12  ;;  %v940_v52 = vsel %vm936_vm11, -inf, %v923_v16 }
 0x3da   : > { %v943_v54 = vmax.f32 %v939_v13, %v940_v52 }
 0x3dc   : > { %v945_v2 = vmax.f32 %v943_v54, %v940_v52 }
 0x3de   : > { %v946_v7 = vrot.slane %v945_v2, 4 }
 0x3e0   : > { %v947_v6 = vmax.f32 %v945_v2, %v946_v7 }
 0x3e2   : > { %v948_v21 = vrot.slane %v947_v6, 2 }
 0x3e4   : > { %v949_v32 = vmax.f32 %v947_v6, %v948_v21 }
 0x3e6   : > { %v950_v22 = vrot.slane %v949_v32, 1 }
 0x3e8   : > { %v951_v23 = vmax.f32 %v949_v32, %v950_v22 }
 0x3ea   : > { %vm956_vm15 = vcmp.ge.f32.partialorder %v1769_v62, %v951_v23 }
 0x41a   : > { %v902_v27 = vpop.xlane.xlu1 %901 }
 0x41b   : > { %vm952_vm14 = vcmp.ge.f32.partialorder %v1769_v62, %v902_v27 }
 0x41c   : > { %vm960_vm0 = vmand %vm952_vm14, %vm956_vm15 }
 0x41d   : > { %vm968_vm2 = vmand %vm960_vm0, %vm964_vm1 }
 0x41e   : > { %vm972_vm3 = vmpackc.low %vm1444_vm12, %vm968_vm2 }
 0x41f   : > { %v974_v28 = vsel %vm972_vm3, 16711935, %v1440_v9 }
 0x420   : > { %v976_v29 = vpack.c.b8 %v975_v20, %v974_v28 }
 0x422   : > { %vm977_vm4 = vnez %v976_v29 }
 0x423   : > { %v978_v30 = vsel %vm977_vm4, 16843009, %v1440_v9 }
 0x424   : > { %979 = vst [vmem:[%s333_s5] sm:$0xff] %v978_v30 }
 0x425   : > { %1399 = shalt.err (!%p1396_p7)
}
 0x426   : > { %1236 = dma.vmem_to_hbm [thread:$0]  (%p1533_p5), %s1038_s20, 128, %s1040_s23, %s1790_s25  }
 0x427 PF: > { %p1250_p8 = scmp.ge.s32.totalorder %s1438_s10, 2  ;;  %s1051_s21 = sand.u32 1, %s1426_s29  }
 0x428   : > { %s1052_s11 = scalar_lea.sflag [#allocation4], %s1051_s21 }
 0x429   : > { %p1241_p9 = pnand %p1250_p8, %p1537_p6 }
 0x42b   : > { %p1242_p10 = pneg %p1241_p9 }
 0x42d   : > { %1417 = dma.done.wait (%p1242_p10), %s1052_s11, 512  }
 0x42e   : > { %1419 = vsyncadd (%p1242_p10), %s1052_s11, 4294966784  ;;  %s1878_s26 = sadd.s32 4294967294, %s1438_s10  }
 0x42f   : > { %s1061_s27 = sand.u32 1, %s1878_s26  }
 0x430   : > { %s1062_s22 = scalar_lea.sflag [#allocation6], %s1061_s27 }
 0x431   : > { %1421 = dma.done.wait (%p1242_p10), %s1062_s22, 640  }
 0x432   : > { %1423 = vsyncadd (%p1242_p10), %s1062_s22, 4294966656  ;;  %p24_p5 = scmp.ge.s32.totalorder %s1518_s12, 4   ;;  %s1879_s29 = smov %s1430_s30 }
 0x433   : > { %s1880_s30 = smov %s1434_s9  ;;  %s1881_s9 = smov %s1531_s15 }
 0x434   : > { %s1882_s10 = smov %s1518_s12  ;;  %26 = sbr.rel (!%p24_p5) target bundleno = 8 (0x8), region = 114 }
 0x439   :  { %1078 = vsyncpa [#allocation4], 1 }
 0x43a   :  { %1080 = vsyncpa [#allocation4 + $0x1], 1 }
 0x43b   :  { %1081 = vsyncpa [#allocation6], 1 }
 0x43c   :  { %1083 = vsyncpa [#allocation6 + $0x1], 1 }

</bundles_post_ra>
